<compile_context>
chip_gen: v7x
topology: tpu7x:2x2x1
jax: 0.10.0
libtpu: 0.0.40
codegen_flags: <defaults>
</compile_context>

<pallas_src>
import functools

import jax
import jax.numpy as jnp
from jax.experimental import pallas as pl
from jax.experimental.pallas import tpu as pltpu


def _round_up(a: int, b: int) -> int:
    return (a + b - 1) // b * b


def _pad2d(a, rows, cols):
    r, c = a.shape
    if r == rows and c == cols:
        return a
    return jnp.zeros((rows, cols), a.dtype).at[:r, :c].set(a)


def _vmem_capacity_bytes() -> int:
    try:
        return int(pltpu.get_tpu_info().vmem_capacity_bytes)
    except Exception:
        return 64 * 1024 * 1024  # conservative fallback (v7x per-core VMEM)


def _estimate_vmem_bytes(tm, dp, th, itemsize, nh):
    """VMEM footprint estimate, including f32 intermediates (per perf review)."""
    wbuf = 1 if nh == 1 else 2                     # Buffered(1) when grid-constant
    resident = wbuf * (2 * dp * th * itemsize + th * 4) + dp * 4   # w1t, w2t, b1, b2
    streamed = 2 * 2 * tm * dp * itemsize          # x and out tiles, double-buffered
    scratch = tm * dp * 4                          # f32 accumulator
    interm = tm * th * (4 + itemsize) + tm * dp * 4  # h (f32 + dtype-cast copy), partial y
    return resident + streamed + scratch + interm


def _choose_hidden_tile(dp, tm, itemsize, budget):
    """Largest th (multiple of 128 dividing dp) whose VMEM estimate fits `budget`."""
    n128 = dp // 128
    chosen = None
    for div in range(n128, 0, -1):          # largest th first
        if n128 % div:
            continue
        th = 128 * div
        need = _estimate_vmem_bytes(tm, dp, th, itemsize, dp // th)
        chosen = (th, need)
        if need <= budget:
            break
    return chosen


def ffn_kernel(x_ref, w1t_ref, b1_ref, w2t_ref, b2_ref, o_ref, acc_ref):
    # x_ref:   (tm, dp)  token tile (full padded feature dim)
    # w1t_ref: (dp, th)  layer_1 weight slice, (in, out) layout
    # b1_ref:  (1, th)   layer_1 bias slice (f32)
    # w2t_ref: (th, dp)  layer_2 weight slice, (in, out) layout
    # b2_ref:  (1, dp)   layer_2 bias (f32)
    # acc_ref: (tm, dp)  f32 accumulator, persists across the H grid axis
    h_idx = pl.program_id(1)

    @pl.when(h_idx == 0)
    def _():
        acc_ref[...] = jnp.zeros_like(acc_ref)

    x = x_ref[...]
    # layer_1 partial: full contraction over input features, f32 MXU accumulate.
    h = jnp.dot(x, w1t_ref[...], preferred_element_type=jnp.float32)
    h = jnp.maximum(h + b1_ref[...], 0.0)
    # Cast back to the input dtype so layer_2 runs at full MXU rate for bf16
    # models (f32 x bf16 would take the slow multi-pass f32 path). f32 -> no-op.
    h = h.astype(x.dtype)

    # layer_2 partial over this hidden block, accumulated in f32.
    acc_ref[...] += jnp.dot(h, w2t_ref[...], preferred_element_type=jnp.float32)

    @pl.when(h_idx == pl.num_programs(1) - 1)
    def _():
        o_ref[...] = (acc_ref[...] + b2_ref[...]).astype(o_ref.dtype)


def prepare_ffn_params(w1, b1, w2, b2):
    """One-time parameter prep (call at parameter-load time, NOT per forward).

    PyTorch nn.Linear weights are (out, in); transpose to (in, out), zero-pad
    feature dims to a multiple of 128 lanes, and pre-cast biases to f32.
    """
    d_model = w1.shape[0]
    dp = _round_up(d_model, 128)
    w1t = _pad2d(jnp.asarray(w1).T, dp, dp)
    w2t = _pad2d(jnp.asarray(w2).T, dp, dp)
    b1p = _pad2d(jnp.asarray(b1, dtype=jnp.float32).reshape(1, -1), 1, dp)
    b2p = _pad2d(jnp.asarray(b2, dtype=jnp.float32).reshape(1, -1), 1, dp)
    return w1t, b1p, w2t, b2p


@functools.partial(jax.jit, static_argnames=("tm",))
def ffn_forward(x, w1t, b1p, w2t, b2p, tm=None):
    """relu(x @ W1.T + b1) @ W2.T + b2 with params from prepare_ffn_params."""
    orig_shape = x.shape
    d_model = orig_shape[-1]
    dp = w1t.shape[0]
    assert dp == _round_up(d_model, 128) and w1t.shape == (dp, dp)

    x2d = x.reshape(-1, d_model)
    m = x2d.shape[0]
    dtype = x.dtype
    itemsize = jnp.dtype(dtype).itemsize

    # Generation-aware VMEM budget (v5e/v6e: 128 MiB, v7x: 64 MiB) with headroom.
    vmem_cap = _vmem_capacity_bytes()
    budget = vmem_cap - 8 * 1024 * 1024

    # --- token (M) tile ------------------------------------------------------
    row_align = 16 if itemsize < 4 else 8
    if tm is None:
        # Larger tiles amortize ~0.35us/step overhead; stay at 256 when VMEM is
        # tight (v7x) or d_model is large.
        tm = 512 if (dp <= 2048 and vmem_cap >= 96 * 1024 * 1024) else 256
    tm_eff = tm if m >= tm else m
    tm_eff = _round_up(tm_eff, row_align)
    mp = _round_up(m, tm_eff)
    # Guarantee >= 2 M blocks so the "parallel" axis shards across v7x's 2 TCs.
    while mp // tm_eff < 2 and tm_eff > row_align:
        tm_eff = _round_up(max(row_align, tm_eff // 2), row_align)
        mp = _round_up(m, tm_eff)
    num_m = mp // tm_eff

    # --- hidden (H) tile, chosen to fit the VMEM budget ----------------------
    th, needed = _choose_hidden_tile(dp, tm_eff, itemsize, budget)
    nh = dp // th
    grid = (num_m, nh)

    xp = _pad2d(x2d, mp, dp)

    # Grid-constant operands are single-buffered (no pointless double buffer).
    const_mode = pl.Buffered(1)
    w_mode = const_mode if nh == 1 else None  # blocks change per h step otherwise

    in_specs = [
        # Streamed token tile: new block per M step, constant over H (no re-DMA).
        pl.BlockSpec((tm_eff, dp), lambda i, h: (i, 0)),
        pl.BlockSpec((dp, th), lambda i, h: (0, h), pipeline_mode=w_mode),
        pl.BlockSpec((1, th), lambda i, h: (0, h), pipeline_mode=w_mode),
        pl.BlockSpec((th, dp), lambda i, h: (h, 0), pipeline_mode=w_mode),
        pl.BlockSpec((1, dp), lambda i, h: (0, 0), pipeline_mode=const_mode),
    ]

    w_itemsize = jnp.dtype(w1t.dtype).itemsize
    weight_bytes = 2 * dp * dp * w_itemsize
    cost = pl.CostEstimate(
        flops=4 * mp * dp * dp,  # two matmuls, 2 flops/MAC
        transcendentals=0,
        bytes_accessed=2 * mp * dp * itemsize
        + (weight_bytes if nh == 1 else num_m * weight_bytes)
        + 2 * dp * 4,
    )

    cp_kwargs = dict(dimension_semantics=("parallel", "arbitrary"))
    want = int(needed * 1.5)
    if want > 16 * 1024 * 1024:
        cp_kwargs["vmem_limit_bytes"] = int(min(budget, max(want, 32 * 1024 * 1024)))

    out = pl.pallas_call(
        ffn_kernel,
        out_shape=jax.ShapeDtypeStruct((mp, dp), dtype),
        grid_spec=pltpu.PrefetchScalarGridSpec(
            num_scalar_prefetch=0,
            grid=grid,
            in_specs=in_specs,
            out_specs=pl.BlockSpec((tm_eff, dp), lambda i, h: (i, 0)),
            scratch_shapes=[pltpu.VMEM((tm_eff, dp), jnp.float32)],
        ),
        compiler_params=pltpu.CompilerParams(**cp_kwargs),
        cost_estimate=cost,
    )(xp, w1t, b1p, w2t, b2p)

    return out[:m, :d_model].reshape(orig_shape)


def ffn_pallas(x, w1, b1, w2, b2):
    """Convenience wrapper matching the PyTorch module signature.

    Prefer calling prepare_ffn_params() once at load time and ffn_forward()
    per step (avoids re-transposing/padding weights on every forward).
    """
    return ffn_forward(x, *prepare_ffn_params(w1, b1, w2, b2))


if __name__ == "__main__":
    # Small shapes implied by the module: x is (batch, seq, d_model).
    batch, seq, d_model = 2, 8, 32

    key = jax.random.PRNGKey(0)
    kx, kw1, kb1, kw2, kb2 = jax.random.split(key, 5)

    x = jax.random.normal(kx, (batch, seq, d_model), dtype=jnp.float32)

    # nn.Linear-style params: W (out, in), b (out,).
    bound = 1.0 / (d_model ** 0.5)
    w1 = jax.random.uniform(kw1, (d_model, d_model), jnp.float32, -bound, bound)
    b1 = jax.random.uniform(kb1, (d_model,), jnp.float32, -bound, bound)
    w2 = jax.random.uniform(kw2, (d_model, d_model), jnp.float32, -bound, bound)
    b2 = jax.random.uniform(kb2, (d_model,), jnp.float32, -bound, bound)

    # One-time parameter prep (hoisted out of the per-step forward path).
    params = prepare_ffn_params(w1, b1, w2, b2)
    jax.block_until_ready(params)

    y = ffn_forward(x, *params)
    jax.block_until_ready(y)

    # Reference (same math as the PyTorch module).
    ref = jnp.maximum(x @ w1.T + b1, 0.0) @ w2.T + b2
    assert y.shape == x.shape
    assert jnp.allclose(y, ref, atol=1e-5, rtol=1e-5)

    print("KERNEL_OK")
</pallas_src>

<mosaic_0001>
module attributes {stable_mosaic.version = 11 : i64} {
  func.func @ffn_kernel(%arg0: i32, %arg1: i32, %arg2: memref<8x128xf32, #tpu.memory_space<vmem>>, %arg3: memref<128x128xf32, #tpu.memory_space<vmem>>, %arg4: memref<1x128xf32, #tpu.memory_space<vmem>>, %arg5: memref<128x128xf32, #tpu.memory_space<vmem>>, %arg6: memref<1x128xf32, #tpu.memory_space<vmem>>, %arg7: memref<8x128xf32, #tpu.memory_space<vmem>>, %arg8: memref<8x128xf32, #tpu.memory_space<vmem>>) attributes {dimension_semantics = [#tpu.dimension_semantics<parallel>, #tpu.dimension_semantics<arbitrary>], iteration_bounds = array<i64: 2, 1>, scalar_prefetch = 0 : i64, scratch_operands = 1 : i64, tpu.core_type = #tpu.core_type<tc>, window_params = [{transform_indices = @transform_0, window_bounds = array<i64: 8, 128>}, {pipeline_mode = #tpu.pipeline_mode<synchronous>, transform_indices = @transform_1, window_bounds = array<i64: 128, 128>}, {pipeline_mode = #tpu.pipeline_mode<synchronous>, transform_indices = @transform_2, window_bounds = array<i64: 1, 128>}, {pipeline_mode = #tpu.pipeline_mode<synchronous>, transform_indices = @transform_3, window_bounds = array<i64: 128, 128>}, {pipeline_mode = #tpu.pipeline_mode<synchronous>, transform_indices = @transform_4, window_bounds = array<i64: 1, 128>}, {transform_indices = @transform_5, window_bounds = array<i64: 8, 128>}]} {
    %c0_i32 = arith.constant 0 : i32
    %0 = arith.cmpi eq, %arg1, %c0_i32 : i32
    %1 = arith.extui %0 : i1 to i32
    %c0_i32_0 = arith.constant 0 : i32
    %2 = arith.cmpi ne, %1, %c0_i32_0 : i32
    scf.if %2 {
      %cst_16 = arith.constant 0.000000e+00 : f32
      %19 = vector.broadcast %cst_16 : f32 to vector<8x128xf32>
      %c0_17 = arith.constant 0 : index
      %c0_18 = arith.constant 0 : index
      %20 = vector.load %arg8[%c0_17, %c0_18] : memref<8x128xf32, #tpu.memory_space<vmem>>, vector<8x128xf32>
      tpu.vector_store %arg8[%c0_17, %c0_18], %19 {strides = array<i32>} : memref<8x128xf32, #tpu.memory_space<vmem>>, vector<8x128xf32>,
    } else {
    }
    %c0 = arith.constant 0 : index
    %c0_1 = arith.constant 0 : index
    %3 = vector.load %arg2[%c0, %c0_1] : memref<8x128xf32, #tpu.memory_space<vmem>>, vector<8x128xf32>
    %c0_2 = arith.constant 0 : index
    %c0_3 = arith.constant 0 : index
    %4 = vector.load %arg3[%c0_2, %c0_3] : memref<128x128xf32, #tpu.memory_space<vmem>>, vector<128x128xf32>
    %cst = arith.constant dense<0.000000e+00> : vector<8x128xf32>
    %5 = tpu.matmul %3, %4, %cst {dimension_numbers = #tpu.dot_dimension_numbers<[1], [0], [0], [1], [0, 0, 1, 1], [], []>} : vector<8x128xf32>, vector<128x128xf32>, vector<8x128xf32> -> vector<8x128xf32>
    %c0_4 = arith.constant 0 : index
    %c0_5 = arith.constant 0 : index
    %6 = vector.load %arg4[%c0_4, %c0_5] : memref<1x128xf32, #tpu.memory_space<vmem>>, vector<1x128xf32>
    %7 = vector.broadcast %6 : vector<1x128xf32> to vector<8x128xf32>
    %8 = arith.addf %5, %7 : vector<8x128xf32>
    %cst_6 = arith.constant 0.000000e+00 : f32
    %9 = vector.broadcast %cst_6 : f32 to vector<8x128xf32>
    %10 = arith.maximumf %8, %9 : vector<8x128xf32>
    %c0_7 = arith.constant 0 : index
    %c0_8 = arith.constant 0 : index
    %11 = vector.load %arg8[%c0_7, %c0_8] : memref<8x128xf32, #tpu.memory_space<vmem>>, vector<8x128xf32>
    %c0_9 = arith.constant 0 : index
    %c0_10 = arith.constant 0 : index
    %12 = vector.load %arg5[%c0_9, %c0_10] : memref<128x128xf32, #tpu.memory_space<vmem>>, vector<128x128xf32>
    %cst_11 = arith.constant dense<0.000000e+00> : vector<8x128xf32>
    %13 = tpu.matmul %10, %12, %cst_11 {dimension_numbers = #tpu.dot_dimension_numbers<[1], [0], [0], [1], [0, 0, 1, 1], [], []>} : vector<8x128xf32>, vector<128x128xf32>, vector<8x128xf32> -> vector<8x128xf32>
    %14 = arith.addf %11, %13 : vector<8x128xf32>
    %c0_12 = arith.constant 0 : index
    %c0_13 = arith.constant 0 : index
    %15 = vector.load %arg8[%c0_12, %c0_13] : memref<8x128xf32, #tpu.memory_space<vmem>>, vector<8x128xf32>
    tpu.vector_store %arg8[%c0_12, %c0_13], %14 {strides = array<i32>} : memref<8x128xf32, #tpu.memory_space<vmem>>, vector<8x128xf32>,
    %c0_i32_14 = arith.constant 0 : i32
    %16 = arith.cmpi eq, %arg1, %c0_i32_14 : i32
    %17 = arith.extui %16 : i1 to i32
    %c0_i32_15 = arith.constant 0 : i32
    %18 = arith.cmpi ne, %17, %c0_i32_15 : i32
    scf.if %18 {
      %c0_16 = arith.constant 0 : index
      %c0_17 = arith.constant 0 : index
      %19 = vector.load %arg8[%c0_16, %c0_17] : memref<8x128xf32, #tpu.memory_space<vmem>>, vector<8x128xf32>
      %c0_18 = arith.constant 0 : index
      %c0_19 = arith.constant 0 : index
      %20 = vector.load %arg6[%c0_18, %c0_19] : memref<1x128xf32, #tpu.memory_space<vmem>>, vector<1x128xf32>
      %21 = vector.broadcast %20 : vector<1x128xf32> to vector<8x128xf32>
      %22 = arith.addf %19, %21 : vector<8x128xf32>
      %c0_20 = arith.constant 0 : index
      %c0_21 = arith.constant 0 : index
      %23 = vector.load %arg7[%c0_20, %c0_21] : memref<8x128xf32, #tpu.memory_space<vmem>>, vector<8x128xf32>
      tpu.vector_store %arg7[%c0_20, %c0_21], %22 {strides = array<i32>} : memref<8x128xf32, #tpu.memory_space<vmem>>, vector<8x128xf32>,
    } else {
    }
    return
  }
  func.func @transform_0(%arg0: i32, %arg1: i32) -> (i32, i32) {
    %c0_i32 = arith.constant 0 : i32
    %c0_i32_0 = arith.constant 0 : i32
    return %arg0, %c0_i32 : i32, i32
  }
  func.func @transform_1(%arg0: i32, %arg1: i32) -> (i32, i32) {
    %c0_i32 = arith.constant 0 : i32
    %c0_i32_0 = arith.constant 0 : i32
    return %c0_i32, %arg1 : i32, i32
  }
  func.func @transform_2(%arg0: i32, %arg1: i32) -> (i32, i32) {
    %c0_i32 = arith.constant 0 : i32
    %c0_i32_0 = arith.constant 0 : i32
    return %c0_i32, %arg1 : i32, i32
  }
  func.func @transform_3(%arg0: i32, %arg1: i32) -> (i32, i32) {
    %c0_i32 = arith.constant 0 : i32
    %c0_i32_0 = arith.constant 0 : i32
    return %arg1, %c0_i32 : i32, i32
  }
  func.func @transform_4(%arg0: i32, %arg1: i32) -> (i32, i32) {
    %c0_i32 = arith.constant 0 : i32
    %c0_i32_0 = arith.constant 0 : i32
    %c0_i32_1 = arith.constant 0 : i32
    return %c0_i32, %c0_i32_0 : i32, i32
  }
  func.func @transform_5(%arg0: i32, %arg1: i32) -> (i32, i32) {
    %c0_i32 = arith.constant 0 : i32
    %c0_i32_0 = arith.constant 0 : i32
    return %arg0, %c0_i32 : i32, i32
  }
}

</mosaic_0001>

<bundles_post_ra>
// kernel: ffn_forward.1
= control target key start
LH: loop header
LB: loop body
LE: loop exit
PB: predicated region body
PF: predicated region fallthrough
CT: control target
= control target key end

     0   :  { %10 = vsyncpa [#allocation4], 0  ;;  %s1079_s0 = inlined_call_operand.vmem [shape: f32[16,128], index: 0, kind: input, shape index: {}]   ;;  %s1080_s1 = inlined_call_operand.hbm [shape: f32[128,128], index: 1, kind: input, shape index: {}]   ;;  %s1081_s2 = inlined_call_operand.vmem [shape: f32[1,128], index: 2, kind: input, shape index: {}]   ;;  %s1082_s3 = inlined_call_operand.hbm [shape: f32[128,128], index: 3, kind: input, shape index: {}]   ;;  %s1083_s4 = inlined_call_operand.vmem [shape: f32[1,128], index: 4, kind: input, shape index: {}]   ;;  %s1084_s5 = inlined_call_operand.vmem [shape: f32[16,128], index: 5, kind: output, shape index: {}]  }
   0x1   :  { %11 = vsyncpa [#allocation6], 0  ;;  %s937_s18 = smov 0   ;;  %s939_s19 = smov 0  }
   0x2   :  { %s941_s20 = smov 0  }
   0x3 LB: > { %s594_s21 = sadd.s32 4294967295, %s898_s20   ;;  %s29_s22 = sadd.s32 1, %s894_s19  ;;  %s898_s20 = sphi %s941_s20, %s17_s20   ;;  %s894_s19 = sphi %s939_s19, %s1094_s19   ;;  %s890_s18 = sphi %s937_s18, %s1093_s18  }
   0x4   : > { %p31_p0 = scmp.ge.s32.totalorder %s29_s22, 2  ;;  %p596_p1 = scmp.ge.s32.totalorder %s898_s20, 1 }
   0x5   : > { %p185_p2 = scmp.lt.s32.totalorder %s898_s20, 3  ;;  %p962_p4 = scmp.eq.s32.totalorder %s594_s21, 0 }
   0x6   : > { %s1096_s22 = smov (%p31_p0, %s29_s22), 0  ;;  %s900_s25 = smov [#allocation3]  }
   0x7   : > { %p958_p3 = pnand %p596_p1, %p185_p2  ;;  %s199_s26 = sshll.u32 %s900_s25, 4  ;;  %s200_s26 = int_to_ptr.vmem [resolvable:$true] %s199_s26 }
   0x8   : > { %s1089_s24 = scalar_select %p962_p4, 1, 0 }
   0x9   : > { %s1088_s23 = scalar_select %p958_p3, 1, 0 }
   0xa   : > { %p770_p5 = pneg %p958_p3  ;;  %s901_s28 = smov [#allocation5]  }
   0xb   : > { %s221_s29 = sshll.u32 %s901_s28, 4  ;;  %s812_s7 = scalar_lea.hbm %s1080_s1, 2048  ;;  %s974_s29 = int_to_ptr.vmem [resolvable:$true] %s221_s29 }
   0xc   : > { %p970_p6 = pnand %p962_p4, %p770_p5  ;;  %p813_p7 = scmp.ne.s32.totalorder %s1080_s1, %s812_s7 }
   0xd   : > { %p819_p11 = scmp.lt.u32.totalorder %s812_s7, %s1080_s1 }
   0xe   : > { %p814_p8 = pneg %p970_p6 }
  0x10   : > { %p815_p9 = pnand %p814_p8, %p813_p7 }
  0x12   : > { %p816_p10 = pneg %p815_p9 }
  0x14   : > { %p821_p12 = pnand %p819_p11, %p816_p10 }
  0x16   : > { %824 = shalt.err (!%p821_p12)
}
  0x17   : > { %s825_s12 = scalar_lea.vmem %s200_s26, 2048  ;;  %p833_p2 = scmp.lt.s32.totalorder %s200_s26, %s200_s26 }
  0x18   : > { %p826_p13 = scmp.ne.s32.totalorder %s200_s26, %s825_s12  ;;  %p834_p5 = scmp.lt.s32.totalorder %s825_s12, %s825_s12 }
  0x1a   : > { %p828_p0 = pnand %p826_p13, %p814_p8  ;;  %p835_p4 = por %p834_p5, %p833_p2 }
  0x1c   : > { %p829_p1 = pneg %p828_p0 }
  0x1e   : > { %p836_p3 = pnand %p835_p4, %p829_p1 }
  0x20   : > { %839 = shalt.err (!%p836_p3)
}
  0x21   : > { %s902_s13 = smov 128   ;;  %s903_s14 = smov 8  }
  0x22   : > { %773 = dma.hbm_to_vmem [thread:$0]  (!%p970_p6), %s1080_s1, 2048, %s200_s26, [#allocation4], %s902_s13, %s902_s13, %s903_s14  }
  0x23   : > { %s840_s25 = scalar_lea.hbm %s1082_s3, 2048 }
  0x24   : > { %p841_p7 = scmp.ne.s32.totalorder %s1082_s3, %s840_s25  ;;  %p847_p9 = scmp.lt.u32.totalorder %s840_s25, %s1082_s3 }
  0x26   : > { %p843_p3 = pnand %p841_p7, %p814_p8 }
  0x28   : > { %p844_p4 = pneg %p843_p3 }
  0x2a   : > { %p849_p10 = pnand %p847_p9, %p844_p4 }
  0x2c   : > { %852 = shalt.err (!%p849_p10)
}
  0x2d   : > { %s853_s26 = scalar_lea.vmem %s974_s29, 2048  ;;  %p861_p0 = scmp.lt.s32.totalorder %s974_s29, %s974_s29 }
  0x2e   : > { %p854_p11 = scmp.ne.s32.totalorder %s974_s29, %s853_s26  ;;  %p862_p1 = scmp.lt.s32.totalorder %s853_s26, %s853_s26 }
  0x30   : > { %p856_p12 = pnand %p854_p11, %p814_p8  ;;  %p863_p2 = por %p862_p1, %p861_p0 }
  0x32   : > { %p857_p13 = pneg %p856_p12 }
  0x34   : > { %p864_p5 = pnand %p863_p2, %p857_p13 }
  0x36   : > { %867 = shalt.err (!%p864_p5)
}
  0x37   : > { %776 = dma.hbm_to_vmem [thread:$0]  (!%p970_p6), %s1082_s3, 2048, %s974_s29, [#allocation6], %s902_s13, %s902_s13, %s903_s14  }
  0x38   : > { %p1091_p7 = scmp.ne.s32.totalorder %s1088_s23, 0 }
  0x39   : > { %p1092_p3 = scmp.ne.s32.totalorder (!%p1091_p7), %s1089_s24, 0 }
  0x3a   : > { %247 = sbr.rel (%p1091_p7) target bundleno = 534 (0x216), region = 40 }
  0x41   : > { %881 = dma.done.wait (%p1092_p3), [#allocation4], 2048  }
  0x42   : > { %883 = vsyncadd (%p1092_p3), [#allocation4], 4294965248 }
  0x43   : > { %885 = dma.done.wait (%p1092_p3), [#allocation6], 2048  }
  0x44   : > { %887 = vsyncadd (%p1092_p3), [#allocation6], 4294965248  ;;  %v904_v0 = vmov 0.0|0.0   ;;  %vm905_vm0 = vmmov 0   ;;  %v906_v1 = vmov 0.0   ;;  %v298_v2 = vld [vmem:[#allocation3] sm:$0xff] }
  0x45   : > { %714 = vmatprep.subr.bf16.mxu0 %v904_v0  ;;  %676 = vmatprep.mubr.msk.f32.mxu0 %vm905_vm0, %v906_v1  ;;  %v299_v3 = vld [vmem:[#allocation3 + $0x8] sm:$0xff]  ;;  %v300_v4 = vld [vmem:[#allocation3 + $0x10] sm:$0xff]  ;;  %v301_v6 = vld [vmem:[#allocation3 + $0x18] sm:$0xff]  ;;  %p280_p6 = scmp.lt.s32.totalorder %s890_s18, 1 }
  0x46   : > { %738 = vmatprep.subr.bf16.mxu1 %v904_v0  ;;  %711 = vmatprep.mubr.msk.f32.mxu1 %vm905_vm0, %v906_v1  ;;  %v715_v5 = vpack.c.bf16 %v299_v3, %v298_v2  ;;  %v718_v7 = vpack.c.bf16 %v301_v6, %v300_v4  ;;  %v302_v8 = vld [vmem:[#allocation3 + $0x20] sm:$0xff]  ;;  %v303_v9 = vld [vmem:[#allocation3 + $0x28] sm:$0xff]  ;;  %v395_v12 = vld [vmem:[#allocation5 + $0x10] sm:$0xff] }
  0x47   : > { %v393_v10 = vld [vmem:[#allocation5] sm:$0xff]  ;;  %v394_v11 = vld [vmem:[#allocation5 + $0x8] sm:$0xff]  ;;  %v396_v13 = vld [vmem:[#allocation5 + $0x18] sm:$0xff]  ;;  %v721_v14 = vpack.c.bf16 %v303_v9, %v302_v8  ;;  %s1098_s18 = smov (!%p280_p6, %s890_s18), 1 }
  0x48   : > { %716 = vmatpush3.bf16.msra.mxu0 %v715_v5  ;;  %v739_v15 = vpack.c.bf16 %v394_v11, %v393_v10  ;;  %v304_v16 = vld [vmem:[#allocation3 + $0x30] sm:$0xff]  ;;  %v305_v17 = vld [vmem:[#allocation3 + $0x38] sm:$0xff]  ;;  %v742_v18 = vpack.c.bf16 %v396_v13, %v395_v12  ;;  %v397_v19 = vld [vmem:[#allocation5 + $0x20] sm:$0xff]  ;;  %s604_s23 = sshll.u32 %s1098_s18, 3 }
  0x49   : > { %717 = vmatprep.subr.bf16.mxu0 %v904_v0  ;;  %v398_v20 = vld [vmem:[#allocation5 + $0x28] sm:$0xff]  ;;  %v724_v21 = vpack.c.bf16 %v305_v17, %v304_v16  ;;  %v306_v22 = vld [vmem:[#allocation3 + $0x40] sm:$0xff]  ;;  %v399_v25 = vld [vmem:[#allocation5 + $0x30] sm:$0xff]  ;;  %s283_s29 = scalar_lea.vmem %s1079_s0, %s604_s23  ;;  %s291_s16 = scalar_lea.vmem %s1084_s5, %s604_s23 }
  0x4a   : > { %740 = vmatpush3.bf16.msra.mxu1 %v739_v15  ;;  %v307_v23 = vld [vmem:[#allocation3 + $0x48] sm:$0xff]  ;;  %v745_v24 = vpack.c.bf16 %v398_v20, %v397_v19  ;;  %v400_v26 = vld [vmem:[#allocation5 + $0x38] sm:$0xff]  ;;  %v308_v28 = vld [vmem:[#allocation3 + $0x50] sm:$0xff] }
  0x4b   : > { %741 = vmatprep.subr.bf16.mxu1 %v904_v0  ;;  %v727_v27 = vpack.c.bf16 %v307_v23, %v306_v22  ;;  %v309_v29 = vld [vmem:[#allocation3 + $0x58] sm:$0xff]  ;;  %v748_v30 = vpack.c.bf16 %v400_v26, %v399_v25  ;;  %v401_v31 = vld [vmem:[#allocation5 + $0x40] sm:$0xff]  ;;  %v402_v32 = vld [vmem:[#allocation5 + $0x48] sm:$0xff] }
  0x4c   : > { %719 = vmatpush3.bf16.msra.mxu0 %v718_v7  ;;  %v730_v33 = vpack.c.bf16 %v309_v29, %v308_v28  ;;  %v310_v34 = vld [vmem:[#allocation3 + $0x60] sm:$0xff]  ;;  %v311_v35 = vld [vmem:[#allocation3 + $0x68] sm:$0xff]  ;;  %v751_v36 = vpack.c.bf16 %v402_v32, %v401_v31  ;;  %v403_v37 = vld [vmem:[#allocation5 + $0x50] sm:$0xff] }
  0x4d   : > { %720 = vmatprep.subr.bf16.mxu0 %v904_v0  ;;  %v404_v38 = vld [vmem:[#allocation5 + $0x58] sm:$0xff]  ;;  %v733_v39 = vpack.c.bf16 %v311_v35, %v310_v34  ;;  %v312_v40 = vld [vmem:[#allocation3 + $0x70] sm:$0xff]  ;;  %v405_v43 = vld [vmem:[#allocation5 + $0x60] sm:$0xff] }
  0x4e   : > { %743 = vmatpush3.bf16.msra.mxu1 %v742_v18  ;;  %v313_v41 = vld [vmem:[#allocation3 + $0x78] sm:$0xff]  ;;  %v754_v42 = vpack.c.bf16 %v404_v38, %v403_v37  ;;  %v406_v44 = vld [vmem:[#allocation5 + $0x68] sm:$0xff]  ;;  %v297_v47 = vld [vmem:[%s283_s29] sm:$0xff] }
  0x4f   : > { %744 = vmatprep.subr.bf16.mxu1 %v904_v0  ;;  %v736_v45 = vpack.c.bf16 %v313_v41, %v312_v40  ;;  %v757_v46 = vpack.c.bf16 %v406_v44, %v405_v43  ;;  %v407_v48 = vld [vmem:[#allocation5 + $0x70] sm:$0xff]  ;;  %v408_v49 = vld [vmem:[#allocation5 + $0x78] sm:$0xff]  ;;  %v606_v51 = vld [vmem:[%s1081_s2] ss:$0 sm:$0xff] }
  0x50   : > { %722 = vmatpush3.bf16.msra.mxu0 %v721_v14  ;;  %v760_v50 = vpack.c.bf16 %v408_v49, %v407_v48  ;;  %v607_v56 = vld [vmem:[%s1083_s4] ss:$0 sm:$0xff] }
  0x51   : > { %723 = vmatprep.subr.bf16.mxu0 %v904_v0 }
  0x52   : > { %746 = vmatpush3.bf16.msra.mxu1 %v745_v24 }
  0x53   : > { %747 = vmatprep.subr.bf16.mxu1 %v904_v0 }
  0x54   : > { %725 = vmatpush3.bf16.msra.mxu0 %v724_v21 }
  0x55   : > { %726 = vmatprep.subr.bf16.mxu0 %v904_v0 }
  0x56   : > { %749 = vmatpush3.bf16.msra.mxu1 %v748_v30 }
  0x57   : > { %750 = vmatprep.subr.bf16.mxu1 %v904_v0 }
  0x58   : > { %728 = vmatpush3.bf16.msra.mxu0 %v727_v27 }
  0x59   : > { %729 = vmatprep.subr.bf16.mxu0 %v904_v0 }
  0x5a   : > { %752 = vmatpush3.bf16.msra.mxu1 %v751_v36 }
  0x5b   : > { %753 = vmatprep.subr.bf16.mxu1 %v904_v0 }
  0x5c   : > { %731 = vmatpush3.bf16.msra.mxu0 %v730_v33 }
  0x5d   : > { %732 = vmatprep.subr.bf16.mxu0 %v904_v0 }
  0x5e   : > { %755 = vmatpush3.bf16.msra.mxu1 %v754_v42 }
  0x5f   : > { %756 = vmatprep.subr.bf16.mxu1 %v904_v0 }
  0x60   : > { %734 = vmatpush3.bf16.msra.mxu0 %v733_v39 }
  0x61   : > { %735 = vmatprep.subr.bf16.mxu0 %v904_v0 }
  0x62   : > { %758 = vmatpush3.bf16.msra.mxu1 %v757_v46 }
  0x63   : > { %759 = vmatprep.subr.bf16.mxu1 %v904_v0 }
  0x64   : > { %737 = vmatpush3.bf16.msra.mxu0 %v736_v45 }
  0x66   : > { %761 = vmatpush3.bf16.msra.mxu1 %v760_v50 }
  0x67   : > { %677 = vmatmul.mubr.f32.vlgmr.msra.gmra.mrb[0].mxu0 %v297_v47 }
 0x13a   : > { %v387_v52 = vpop.f32.mrb[0].mxu0 }
 0x13b   : > { %v388_v53 = vadd.f32 %v606_v51, %v387_v52  ;;  %v678_v54 = vpop.f32.mrb[1].mxu0 }
 0x13d   : > { %v391_v55 = vmax.f32 %v388_v53, 0.0 }
 0x13f   : > { %712 = vmatmul.mubr.f32.vlgmr.msra.gmra.mrb[0].mxu1 %v391_v55 }
 0x212   : > { %v475_v57 = vpop.f32.mrb[0].mxu1 }
 0x213   : > { %v492_v58 = vadd.f32 %v607_v56, %v475_v57  ;;  %v713_v59 = vpop.f32.mrb[1].mxu1 }
 0x215   : > { %493 = vst [vmem:[%s291_s16] sm:$0xff] %v492_v58 }
 0x216 PF: > { %s17_s20 = sadd.s32 1, %s898_s20   ;;  %s1093_s18 = smov %s894_s19 }
 0x217   : > { %p14_p8 = scmp.ge.s32.totalorder %s17_s20, 4   ;;  %s1094_s19 = smov %s1096_s22 }
 0x219   :  { %16 = sbr.rel (!%p14_p8) target bundleno = 3 (0x3), region = 92 }
 0x220   :  { %513 = vsyncpa [#allocation4], 1 }
 0x221   :  { %515 = vsyncpa [#allocation4 + $0x1], 1 }
 0x222   :  { %516 = vsyncpa [#allocation6], 1 }

</bundles_post_ra>
